<compile_context>
chip_gen: v6e
topology: v6e:2x2x1
jax: 0.10.0
libtpu: 0.0.40
codegen_flags: <defaults>
</compile_context>

<pallas_src>
import functools

import jax
import jax.numpy as jnp
from jax import lax
from jax.experimental import pallas as pl
from jax.experimental.pallas import tpu as pltpu

LANES = 128            # lane width (fast axis)
SUBLANES = 8           # f32 sublane count (one vreg is 8 x 128)
CHUNK_ROWS = 512       # rows per inner compute chunk (256 KiB f32)
MAX_TILE_ROWS = 8192   # rows per grid-step DMA block (4 MiB f32 per input)
NEUTRAL_X = -1e4       # sigmoid -> 0, softplus -> 0; finite in fp16/bf16


def _cdiv(a, b):
    return -(-a // b)


def _dice_bce_kernel(x_ref, t_ref, out_ref, acc_ref, *,
                     valid_rows, tile_rows, chunk_rows, steps_per_split):
    """Accumulates vreg-shaped partial sums of (p*t, p+t, bce); on the last
    step of each split the raw (3, 8, 128) accumulator is written out."""
    s = pl.program_id(0)       # TensorCore split ("parallel")
    i = pl.program_id(1)       # streaming step within the split ("arbitrary")

    @pl.when(i == 0)
    def _init():
        acc_ref[...] = jnp.zeros_like(acc_ref)

    # Unclamped global row offset of this block.  (The index_map clamps the
    # DMA to the last real block; keeping the virtual offset here makes the
    # redundant blocks of an uneven split mask to an exact 0 contribution.)
    block_idx = s * steps_per_split + i
    row_start = block_idx * tile_rows

    num_chunks = tile_rows // chunk_rows
    row_iota = lax.broadcasted_iota(jnp.int32, (chunk_rows, LANES), 0)  # hoisted

    @pl.loop(0, num_chunks)
    def _chunk(c):
        off = pl.multiple_of(c * chunk_rows, chunk_rows)
        x = x_ref[pl.ds(off, chunk_rows), :].astype(jnp.float32)
        t = t_ref[pl.ds(off, chunk_rows), :].astype(jnp.float32)

        # Tail mask: rows at/after `valid_rows` (partial edge blocks, clamped
        # redundant blocks) are replaced by neutral values -> exact 0 sums.
        rows_left = valid_rows - (row_start + c * chunk_rows)
        valid = row_iota < rows_left
        x = jnp.where(valid, x, NEUTRAL_X)
        t = jnp.where(valid, t, 0.0)

        # sigmoid and softplus share one exp(-|x|) (EUP).
        e = jnp.exp(-jnp.abs(x))
        inv = pl.reciprocal(1.0 + e, approx=True)       # EUP slot, not VALU
        p = jnp.where(x >= 0, 1.0, e) * inv             # sigmoid(x)
        sp = jnp.maximum(x, 0.0) + jnp.log1p(e)         # softplus(x) = -log(1-p)

        # torch binary_cross_entropy with its -100 log clamp, in logit space:
        #   bce = t*min(sp - x, 100) + (1-t)*min(sp, 100) = m1 + t*(m0 - m1)
        m0 = jnp.minimum(sp - x, 100.0)
        m1 = jnp.minimum(sp, 100.0)
        bce = m1 + t * (m0 - m1)

        def vreg_sum(v):  # (chunk_rows, 128) -> (8, 128); pure VPU adds
            return jnp.sum(v.reshape(-1, SUBLANES, LANES), axis=0)

        acc_ref[0] += vreg_sum(p * t)     # intersection
        acc_ref[1] += vreg_sum(p + t)     # sum(p) + sum(t) (only used fused)
        acc_ref[2] += vreg_sum(bce)       # summed BCE

    @pl.when(i == pl.num_programs(1) - 1)
    def _finalize():
        out_ref[0] = acc_ref[...]


def dice_bce_loss(inputs, targets, smooth=1.0, *,
                  max_tile_rows=MAX_TILE_ROWS, chunk_rows=CHUNK_ROWS):
    """JAX/Pallas equivalent of DiceBCELoss.forward(inputs, targets, smooth)."""
    n = int(inputs.size)
    x = jnp.ravel(inputs)                 # keep caller dtype through the DMA
    t = jnp.ravel(targets)

    rows_needed = _cdiv(n, LANES)
    padded_rows = max(rows_needed, SUBLANES)
    padded_len = padded_rows * LANES
    if padded_len != n:
        # Only when n isn't a multiple of 128 (or is tiny): pad the lane tail
        # with neutral values (exact 0 contribution).  128-aligned inputs are
        # never copied.
        x = jnp.pad(x, (0, padded_len - n), constant_values=NEUTRAL_X)
        t = jnp.pad(t, (0, padded_len - n), constant_values=0)
    x2 = x.reshape(padded_rows, LANES)
    t2 = t.reshape(padded_rows, LANES)

    # Tile selection: biggest 8-aligned block <= max_tile_rows that never
    # exceeds the array and divides cleanly into compute chunks.
    tile_rows = min(max_tile_rows, (padded_rows // SUBLANES) * SUBLANES)
    chunk = min(chunk_rows, tile_rows)
    chunk = (chunk // SUBLANES) * SUBLANES
    tile_rows = (tile_rows // chunk) * chunk

    total_blocks = _cdiv(padded_rows, tile_rows)
    num_splits = 2 if total_blocks >= 2 else 1          # 2 TensorCores on v7x
    steps_per_split = _cdiv(total_blocks, num_splits)
    last_block = total_blocks - 1

    def in_map(s, i):
        # Clamp so the redundant trailing block of an uneven split re-reads
        # the last real block (its contribution is masked to 0 in-kernel).
        return (jnp.minimum(s * steps_per_split + i, last_block), 0)

    tile_spec = pl.BlockSpec((tile_rows, LANES), in_map)

    kernel = functools.partial(
        _dice_bce_kernel,
        valid_rows=rows_needed, tile_rows=tile_rows,
        chunk_rows=chunk, steps_per_split=steps_per_split)

    cost = pl.CostEstimate(
        flops=20 * n,
        transcendentals=3 * n,
        bytes_accessed=n * (x2.dtype.itemsize + t2.dtype.itemsize))

    partials = pl.pallas_call(
        kernel,
        out_shape=jax.ShapeDtypeStruct((num_splits, 3, SUBLANES, LANES),
                                       jnp.float32),
        grid_spec=pltpu.PrefetchScalarGridSpec(
            num_scalar_prefetch=0,
            grid=(num_splits, steps_per_split),
            in_specs=[tile_spec, tile_spec],
            out_specs=pl.BlockSpec((1, 3, SUBLANES, LANES),
                                   lambda s, i: (s, 0, 0, 0)),
            scratch_shapes=[pltpu.VMEM((3, SUBLANES, LANES), jnp.float32)],
        ),
        compiler_params=pltpu.CompilerParams(
            dimension_semantics=("parallel", "arbitrary"),
            vmem_limit_bytes=32 * 1024 * 1024),
        cost_estimate=cost,
    )(x2, t2)

    # Tiny final combine (3 scalars) in plain JAX.
    sums = jnp.sum(partials, axis=(0, 2, 3))
    intersection, pt_sum, bce_sum = sums[0], sums[1], sums[2]
    dice_loss = 1.0 - (2.0 * intersection + smooth) / (pt_sum + smooth)
    bce_mean = bce_sum / n
    return 0.2 * bce_mean + 0.8 * dice_loss


def _reference_dice_bce(inputs, targets, smooth=1.0):
    p = jax.nn.sigmoid(inputs.astype(jnp.float32)).reshape(-1)
    t = targets.astype(jnp.float32).reshape(-1)
    intersection = jnp.sum(p * t)
    dice = 1.0 - (2.0 * intersection + smooth) / (jnp.sum(p) + jnp.sum(t) + smooth)
    log_p = jnp.maximum(jnp.log(p), -100.0)
    log_1mp = jnp.maximum(jnp.log1p(-p), -100.0)
    bce = jnp.mean(-(t * log_p + (1.0 - t) * log_1mp))
    return 0.2 * bce + 0.8 * dice


def _check(shape, key, **kwargs):
    k1, k2 = jax.random.split(key)
    logits = jax.random.normal(k1, shape, dtype=jnp.float32)
    targets = (jax.random.uniform(k2, shape) > 0.5).astype(jnp.float32)
    loss = jax.block_until_ready(dice_bce_loss(logits, targets, smooth=1.0, **kwargs))
    ref = _reference_dice_bce(logits, targets, smooth=1.0)
    # 2e-3 tolerance absorbs the approximate EUP reciprocal used for sigmoid.
    assert jnp.allclose(loss, ref, atol=2e-3, rtol=2e-3), (shape, loss, ref)


if __name__ == "__main__":
    key = jax.random.PRNGKey(0)
    k_a, k_b, k_c, k_d = jax.random.split(key, 4)

    # Segmentation-style (N, C, H, W), 128-aligned: no host padding.
    _check((2, 4, 16, 16), k_a)
    # 13 rows of 128: partial edge block + garbage-row masking + 2-way split.
    _check((13, 128), k_b)
    # Non-128-multiple element count: lane-tail neutral padding path.
    _check((3, 5, 9), k_c)
    # Small tiles forced: multi-chunk inner loop, multi-step accumulation,
    # odd block count -> clamped redundant block of the uneven split.
    _check((40, 128), k_d, max_tile_rows=16, chunk_rows=8)

    print("KERNEL_OK")
</pallas_src>

<mosaic_0001>
module attributes {stable_mosaic.version = 11 : i64} {
  func.func @_dice_bce_kernel(%arg0: i32, %arg1: i32, %arg2: memref<16x128xf32, #tpu.memory_space<vmem>>, %arg3: memref<16x128xf32, #tpu.memory_space<vmem>>, %arg4: memref<1x3x8x128xf32, #tpu.memory_space<vmem>>, %arg5: memref<3x8x128xf32, #tpu.memory_space<vmem>>) attributes {dimension_semantics = [#tpu.dimension_semantics<parallel>, #tpu.dimension_semantics<arbitrary>], iteration_bounds = array<i64: 1, 1>, scalar_prefetch = 0 : i64, scratch_operands = 1 : i64, tpu.core_type = #tpu.core_type<tc>, window_params = [{transform_indices = @transform_0, window_bounds = array<i64: 16, 128>}, {transform_indices = @transform_1, window_bounds = array<i64: 16, 128>}, {transform_indices = @transform_2, window_bounds = array<i64: 1, 3, 8, 128>}]} {
    %c0_i32 = arith.constant 0 : i32
    %0 = arith.cmpi eq, %arg1, %c0_i32 : i32
    %1 = arith.extui %0 : i1 to i32
    %c0_i32_0 = arith.constant 0 : i32
    %2 = arith.cmpi ne, %1, %c0_i32_0 : i32
    scf.if %2 {
      %cst_38 = arith.constant 0.000000e+00 : f32
      %77 = vector.broadcast %cst_38 : f32 to vector<3x8x128xf32>
      %c0_39 = arith.constant 0 : index
      %c0_40 = arith.constant 0 : index
      %c0_41 = arith.constant 0 : index
      %78 = vector.load %arg5[%c0_39, %c0_40, %c0_41] : memref<3x8x128xf32, #tpu.memory_space<vmem>>, vector<3x8x128xf32>
      tpu.vector_store %arg5[%c0_39, %c0_40, %c0_41], %77 {strides = array<i32>} : memref<3x8x128xf32, #tpu.memory_space<vmem>>, vector<3x8x128xf32>,
    } else {
    }
    %c1_i32 = arith.constant 1 : i32
    %3 = arith.muli %arg0, %c1_i32 : i32
    %4 = arith.addi %3, %arg1 : i32
    %c16_i32 = arith.constant 16 : i32
    %5 = arith.muli %4, %c16_i32 : i32
    %6 = tpu.iota {dimensions = array<i32: 0>} : vector<16x128xi32>
    %c0_i32_1 = arith.constant 0 : i32
    %c1_i32_2 = arith.constant 1 : i32
    %7 = arith.muli %c0_i32_1, %c1_i32_2 : i32
    %c0_i32_3 = arith.constant 0 : i32
    %8 = arith.addi %c0_i32_3, %7 : i32
    %c16_i32_4 = arith.constant 16 : i32
    %9 = arith.muli %8, %c16_i32_4 : i32
    %10 = tpu.assume_multiple %9, 16 : i32
    %11 = arith.index_cast %10 : i32 to index
    %c0 = arith.constant 0 : index
    %12 = vector.load %arg2[%11, %c0] : memref<16x128xf32, #tpu.memory_space<vmem>>, vector<16x128xf32>
    %13 = arith.index_cast %10 : i32 to index
    %c0_5 = arith.constant 0 : index
    %14 = vector.load %arg3[%13, %c0_5] : memref<16x128xf32, #tpu.memory_space<vmem>>, vector<16x128xf32>
    %c16_i32_6 = arith.constant 16 : i32
    %15 = arith.muli %8, %c16_i32_6 : i32
    %16 = arith.addi %5, %15 : i32
    %c16_i32_7 = arith.constant 16 : i32
    %17 = arith.subi %c16_i32_7, %16 : i32
    %18 = vector.broadcast %17 : i32 to vector<16x128xi32>
    %19 = arith.cmpi slt, %6, %18 : vector<16x128xi32>
    %cst = arith.constant -1.000000e+04 : f32
    %20 = vector.broadcast %cst : f32 to vector<16x128xf32>
    %21 = arith.select %19, %12, %20 : vector<16x128xi1>, vector<16x128xf32>
    %cst_8 = arith.constant 0.000000e+00 : f32
    %22 = vector.broadcast %cst_8 : f32 to vector<16x128xf32>
    %23 = arith.select %19, %14, %22 : vector<16x128xi1>, vector<16x128xf32>
    %24 = math.absf %21 : vector<16x128xf32>
    %cst_9 = arith.constant 0.000000e+00 : f32
    %25 = vector.broadcast %cst_9 : f32 to vector<16x128xf32>
    %26 = arith.subf %25, %24 : vector<16x128xf32>
    %27 = math.exp %26 : vector<16x128xf32>
    %cst_10 = arith.constant 1.000000e+00 : f32
    %28 = vector.broadcast %cst_10 : f32 to vector<16x128xf32>
    %29 = arith.addf %28, %27 : vector<16x128xf32>
    %30 = tpu.reciprocal %29 {approx = true} : vector<16x128xf32> -> vector<16x128xf32>
    %cst_11 = arith.constant 0.000000e+00 : f32
    %31 = vector.broadcast %cst_11 : f32 to vector<16x128xf32>
    %32 = arith.cmpf oge, %21, %31 : vector<16x128xf32>
    %cst_12 = arith.constant 1.000000e+00 : f32
    %33 = vector.broadcast %cst_12 : f32 to vector<16x128xf32>
    %34 = arith.select %32, %33, %27 : vector<16x128xi1>, vector<16x128xf32>
    %35 = arith.mulf %34, %30 : vector<16x128xf32>
    %cst_13 = arith.constant 0.000000e+00 : f32
    %36 = vector.broadcast %cst_13 : f32 to vector<16x128xf32>
    %37 = arith.maximumf %21, %36 : vector<16x128xf32>
    %38 = math.log1p %27 : vector<16x128xf32>
    %39 = arith.addf %37, %38 : vector<16x128xf32>
    %40 = arith.subf %39, %21 : vector<16x128xf32>
    %cst_14 = arith.constant 1.000000e+02 : f32
    %41 = vector.broadcast %cst_14 : f32 to vector<16x128xf32>
    %42 = arith.minimumf %40, %41 : vector<16x128xf32>
    %cst_15 = arith.constant 1.000000e+02 : f32
    %43 = vector.broadcast %cst_15 : f32 to vector<16x128xf32>
    %44 = arith.minimumf %39, %43 : vector<16x128xf32>
    %45 = arith.subf %42, %44 : vector<16x128xf32>
    %46 = arith.mulf %23, %45 : vector<16x128xf32>
    %47 = arith.addf %44, %46 : vector<16x128xf32>
    %c0_16 = arith.constant 0 : index
    %c0_17 = arith.constant 0 : index
    %c0_18 = arith.constant 0 : index
    %48 = vector.load %arg5[%c0_16, %c0_17, %c0_18] : memref<3x8x128xf32, #tpu.memory_space<vmem>>, vector<1x8x128xf32>
    %49 = vector.shape_cast %48 : vector<1x8x128xf32> to vector<8x128xf32>
    %50 = arith.mulf %35, %23 : vector<16x128xf32>
    %51 = vector.shape_cast %50 : vector<16x128xf32> to vector<2x8x128xf32>
    %cst_19 = arith.constant dense<0.000000e+00> : vector<8x128xf32>
    %52 = vector.multi_reduction <add>, %51, %cst_19 [0] : vector<2x8x128xf32> to vector<8x128xf32>
    %53 = arith.addf %49, %52 : vector<8x128xf32>
    %c0_20 = arith.constant 0 : index
    %c0_21 = arith.constant 0 : index
    %c0_22 = arith.constant 0 : index
    %54 = vector.load %arg5[%c0_20, %c0_21, %c0_22] : memref<3x8x128xf32, #tpu.memory_space<vmem>>, vector<1x8x128xf32>
    %55 = vector.shape_cast %54 : vector<1x8x128xf32> to vector<8x128xf32>
    %56 = vector.shape_cast %53 : vector<8x128xf32> to vector<1x8x128xf32>
    tpu.vector_store %arg5[%c0_20, %c0_21, %c0_22], %56 {strides = array<i32>} : memref<3x8x128xf32, #tpu.memory_space<vmem>>, vector<1x8x128xf32>,
    %c1 = arith.constant 1 : index
    %c0_23 = arith.constant 0 : index
    %c0_24 = arith.constant 0 : index
    %57 = vector.load %arg5[%c1, %c0_23, %c0_24] : memref<3x8x128xf32, #tpu.memory_space<vmem>>, vector<1x8x128xf32>
    %58 = vector.shape_cast %57 : vector<1x8x128xf32> to vector<8x128xf32>
    %59 = arith.addf %35, %23 : vector<16x128xf32>
    %60 = vector.shape_cast %59 : vector<16x128xf32> to vector<2x8x128xf32>
    %cst_25 = arith.constant dense<0.000000e+00> : vector<8x128xf32>
    %61 = vector.multi_reduction <add>, %60, %cst_25 [0] : vector<2x8x128xf32> to vector<8x128xf32>
    %62 = arith.addf %58, %61 : vector<8x128xf32>
    %c1_26 = arith.constant 1 : index
    %c0_27 = arith.constant 0 : index
    %c0_28 = arith.constant 0 : index
    %63 = vector.load %arg5[%c1_26, %c0_27, %c0_28] : memref<3x8x128xf32, #tpu.memory_space<vmem>>, vector<1x8x128xf32>
    %64 = vector.shape_cast %63 : vector<1x8x128xf32> to vector<8x128xf32>
    %65 = vector.shape_cast %62 : vector<8x128xf32> to vector<1x8x128xf32>
    tpu.vector_store %arg5[%c1_26, %c0_27, %c0_28], %65 {strides = array<i32>} : memref<3x8x128xf32, #tpu.memory_space<vmem>>, vector<1x8x128xf32>,
    %c2 = arith.constant 2 : index
    %c0_29 = arith.constant 0 : index
    %c0_30 = arith.constant 0 : index
    %66 = vector.load %arg5[%c2, %c0_29, %c0_30] : memref<3x8x128xf32, #tpu.memory_space<vmem>>, vector<1x8x128xf32>
    %67 = vector.shape_cast %66 : vector<1x8x128xf32> to vector<8x128xf32>
    %68 = vector.shape_cast %47 : vector<16x128xf32> to vector<2x8x128xf32>
    %cst_31 = arith.constant dense<0.000000e+00> : vector<8x128xf32>
    %69 = vector.multi_reduction <add>, %68, %cst_31 [0] : vector<2x8x128xf32> to vector<8x128xf32>
    %70 = arith.addf %67, %69 : vector<8x128xf32>
    %c2_32 = arith.constant 2 : index
    %c0_33 = arith.constant 0 : index
    %c0_34 = arith.constant 0 : index
    %71 = vector.load %arg5[%c2_32, %c0_33, %c0_34] : memref<3x8x128xf32, #tpu.memory_space<vmem>>, vector<1x8x128xf32>
    %72 = vector.shape_cast %71 : vector<1x8x128xf32> to vector<8x128xf32>
    %73 = vector.shape_cast %70 : vector<8x128xf32> to vector<1x8x128xf32>
    tpu.vector_store %arg5[%c2_32, %c0_33, %c0_34], %73 {strides = array<i32>} : memref<3x8x128xf32, #tpu.memory_space<vmem>>, vector<1x8x128xf32>,
    %c1_i32_35 = arith.constant 1 : i32
    %c0_i32_36 = arith.constant 0 : i32
    %74 = arith.cmpi eq, %arg1, %c0_i32_36 : i32
    %75 = arith.extui %74 : i1 to i32
    %c0_i32_37 = arith.constant 0 : i32
    %76 = arith.cmpi ne, %75, %c0_i32_37 : i32
    scf.if %76 {
      %c0_38 = arith.constant 0 : index
      %c0_39 = arith.constant 0 : index
      %c0_40 = arith.constant 0 : index
      %77 = vector.load %arg5[%c0_38, %c0_39, %c0_40] : memref<3x8x128xf32, #tpu.memory_space<vmem>>, vector<3x8x128xf32>
      %c0_41 = arith.constant 0 : index
      %c0_42 = arith.constant 0 : index
      %c0_43 = arith.constant 0 : index
      %c0_44 = arith.constant 0 : index
      %78 = vector.load %arg4[%c0_41, %c0_42, %c0_43, %c0_44] : memref<1x3x8x128xf32, #tpu.memory_space<vmem>>, vector<1x3x8x128xf32>
      %79 = vector.shape_cast %78 : vector<1x3x8x128xf32> to vector<3x8x128xf32>
      %80 = vector.shape_cast %77 : vector<3x8x128xf32> to vector<1x3x8x128xf32>
      tpu.vector_store %arg4[%c0_41, %c0_42, %c0_43, %c0_44], %80 {strides = array<i32>} : memref<1x3x8x128xf32, #tpu.memory_space<vmem>>, vector<1x3x8x128xf32>,
    } else {
    }
    return
  }
  func.func @transform_0(%arg0: i32, %arg1: i32) -> (i32, i32) {
    %c1_i32 = arith.constant 1 : i32
    %0 = arith.muli %arg0, %c1_i32 : i32
    %1 = arith.addi %0, %arg1 : i32
    %c0_i32 = arith.constant 0 : i32
    %2 = arith.minsi %1, %c0_i32 : i32
    %c0_i32_0 = arith.constant 0 : i32
    %c0_i32_1 = arith.constant 0 : i32
    return %2, %c0_i32_0 : i32, i32
  }
  func.func @transform_1(%arg0: i32, %arg1: i32) -> (i32, i32) {
    %c1_i32 = arith.constant 1 : i32
    %0 = arith.muli %arg0, %c1_i32 : i32
    %1 = arith.addi %0, %arg1 : i32
    %c0_i32 = arith.constant 0 : i32
    %2 = arith.minsi %1, %c0_i32 : i32
    %c0_i32_0 = arith.constant 0 : i32
    %c0_i32_1 = arith.constant 0 : i32
    return %2, %c0_i32_0 : i32, i32
  }
  func.func @transform_2(%arg0: i32, %arg1: i32) -> (i32, i32, i32, i32) {
    %c0_i32 = arith.constant 0 : i32
    %c0_i32_0 = arith.constant 0 : i32
    %c0_i32_1 = arith.constant 0 : i32
    %c0_i32_2 = arith.constant 0 : i32
    return %arg0, %c0_i32, %c0_i32_0, %c0_i32_1 : i32, i32, i32, i32
  }
}

</mosaic_0001>

<bundles_post_ra>
// kernel: tpu_custom_call.1
= control target key start
LH: loop header
LB: loop body
LE: loop exit
PB: predicated region body
PF: predicated region fallthrough
CT: control target
= control target key end

     0   :  { %7 = vsyncpa [#allocation4], 0  ;;  %s306_s0 = inlined_call_operand.hbm [shape: f32[16,128], index: 0, kind: input, shape index: {}]   ;;  %s307_s1 = inlined_call_operand.hbm [shape: f32[16,128], index: 1, kind: input, shape index: {}]   ;;  %s308_s2 = inlined_call_operand.hbm [shape: f32[1,3,8,128], index: 2, kind: output, shape index: {}]  }
   0x1   :  { %8 = vsyncpa [#allocation7], 0 }
   0x2   :  { %9 = vsyncpa [#allocation5], 0  ;;  %s268_s9 = smov [#allocation3]  }
   0x3   :  { %s21_s10 = sshll.u32 %s268_s9, 4  ;;  %s22_s10 = int_to_ptr.vmem [resolvable:$true] %s21_s10 }
   0x4   :  { %s210_s11 = scalar_lea.vmem %s22_s10, 256  ;;  %p215_p1 = scmp.lt.s32.totalorder %s22_s10, %s22_s10 }
   0x5   :  { %p211_p0 = scmp.ne.s32.totalorder %s22_s10, %s210_s11  ;;  %p216_p2 = scmp.lt.s32.totalorder %s210_s11, %s210_s11 }
   0x7   :  { %p217_p3 = por %p216_p2, %p215_p1 }
   0x9   :  { %p218_p4 = pnand %p217_p3, %p211_p0 }
   0xb   :  { %221 = shalt.err (!%p218_p4)
}
   0xc   :  { %s269_s12 = smov 128   ;;  %s270_s13 = smov 8  }
   0xd   :  { %27 = dma.hbm_to_vmem [thread:$0]  %s306_s0, 256, %s22_s10, [#allocation4], %s269_s12, %s269_s12, %s270_s13  }
   0xe   :  { %s271_s16 = smov [#allocation6]  }
   0xf   :  { %s39_s17 = sshll.u32 %s271_s16, 4  ;;  %s40_s17 = int_to_ptr.vmem [resolvable:$true] %s39_s17 }
  0x10   :  { %s230_s18 = scalar_lea.vmem %s40_s17, 256  ;;  %p235_p6 = scmp.lt.s32.totalorder %s40_s17, %s40_s17 }
  0x11   :  { %p231_p5 = scmp.ne.s32.totalorder %s40_s17, %s230_s18  ;;  %p236_p7 = scmp.lt.s32.totalorder %s230_s18, %s230_s18 }
  0x13   :  { %p237_p8 = por %p236_p7, %p235_p6 }
  0x15   :  { %p238_p9 = pnand %p237_p8, %p231_p5 }
  0x17   :  { %241 = shalt.err (!%p238_p9)
}
  0x18   :  { %45 = dma.hbm_to_vmem [thread:$0]  %s307_s1, 256, %s40_s17, [#allocation7], %s269_s12, %s269_s12, %s270_s13  }
  0x19   :  { %262 = dma.done.wait [#allocation4], 256  }
  0x1a   :  { %263 = vsyncadd [#allocation4], 4294967040 }
  0x1b   :  { %264 = dma.done.wait [#allocation7], 256  }
  0x1c   :  { %265 = vsyncadd [#allocation7], 4294967040  ;;  %v72_v0 = vld [vmem:[#allocation3] sm:$0xff]  ;;  %v73_v1 = vld [vmem:[#allocation3 + $0x8] sm:$0xff]  ;;  %s272_s0 = smov [#allocation8]  }
  0x1d   :  { %v84_v2 = vand.u32 2147483647, %v72_v0  ;;  %v85_v3 = vand.u32 2147483647, %v73_v1  ;;  %vm96_vm0 = vcmp.ge.f32.partialorder %v72_v0, 0.0  ;;  %vm97_vm1 = vcmp.ge.f32.partialorder %v73_v1, 0.0 }
  0x1e   :  { %v102_v23 = vmax.f32 %v72_v0, 0.0  ;;  %v74_v26 = vld [vmem:[#allocation6] sm:$0xff]  ;;  %v103_v28 = vmax.f32 %v73_v1, 0.0  ;;  %v75_v31 = vld [vmem:[#allocation6 + $0x8] sm:$0xff]  ;;  %s168_s1 = sshll.u32 %s272_s0, 4  ;;  %s169_s1 = int_to_ptr.vmem [resolvable:$true] %s168_s1 }
  0x1f   :  { %v86_v4 = vsub.f32 0.0, %v84_v2  ;;  %v87_v5 = vsub.f32 0.0, %v85_v3  ;;  %s242_s21 = scalar_lea.vmem %s169_s1, 384  ;;  %p247_p11 = scmp.lt.s32.totalorder %s169_s1, %s169_s1 }
  0x20   :  { %p243_p10 = scmp.ne.s32.totalorder %s169_s1, %s242_s21  ;;  %p248_p12 = scmp.lt.s32.totalorder %s242_s21, %s242_s21 }
  0x21   :  { %v88_v6 = vmul.f32 1.442695, %v86_v4  ;;  %v90_v7 = vmul.f32 1.442695, %v87_v5 }
  0x22   :  { %p249_p13 = por %p248_p12, %p247_p11 }
  0x23   :  { %190 = vpow2.f32 %v88_v6 }
  0x24   :  { %192 = vpow2.f32 %v90_v7  ;;  %p250_p0 = pnand %p249_p13, %p243_p10 }
  0x30   :  { %v191_v8 = vpop.eup %190 }
  0x31   :  { %v193_v9 = vpop.eup %192  ;;  %v92_v10 = vadd.f32 1.0, %v191_v8  ;;  %v107_v12 = vmul.f32 -0.5, %v191_v8  ;;  %v98_v15 = vsel %vm96_vm0, 1.0, %v191_v8  ;;  %v110_v16 = vand.u32 2147483647, %v191_v8 }
  0x32   :  { %v93_v11 = vadd.f32 1.0, %v193_v9  ;;  %v116_v13 = vmul.f32 -0.5, %v193_v9  ;;  %v99_v18 = vsel %vm97_vm1, 1.0, %v193_v9  ;;  %v119_v19 = vand.u32 2147483647, %v193_v9 }
  0x33   :  { %194 = vrcp.f32 %v92_v10  ;;  %v108_v14 = vadd.f32 1.0, %v107_v12  ;;  %vm111_vm2 = vcmp.lt.f32.partialorder %v110_v16, 0.0004427343 }
  0x34   :  { %196 = vrcp.f32 %v93_v11  ;;  %v117_v17 = vadd.f32 1.0, %v116_v13  ;;  %vm120_vm3 = vcmp.lt.f32.partialorder %v119_v19, 0.0004427343 }
  0x35   :  { %198 = vlog2.f32 %v92_v10  ;;  %v109_v24 = vmul.f32 %v191_v8, %v108_v14 }
  0x36   :  { %200 = vlog2.f32 %v93_v11  ;;  %v118_v29 = vmul.f32 %v193_v9, %v117_v17 }
  0x40   :  { %v195_v20 = vpop.eup %194 }
  0x41   :  { %v197_v21 = vpop.eup %196  ;;  %v100_v22 = vmul.f32 %v195_v20, %v98_v15 }
  0x42   :  { %v199_v25 = vpop.eup %198  ;;  %v101_v27 = vmul.f32 %v197_v21, %v99_v18 }
  0x43   :  { %v201_v30 = vpop.eup %200  ;;  %v137_v32 = vmul.f32 %v100_v22, %v74_v26  ;;  %v144_v33 = vadd.f32 %v100_v22, %v74_v26  ;;  %v106_v34 = vmul.f32 0.6931472, %v199_v25 }
  0x44   :  { %v138_v35 = vmul.f32 %v101_v27, %v75_v31  ;;  %v145_v36 = vadd.f32 %v101_v27, %v75_v31  ;;  %v115_v37 = vmul.f32 0.6931472, %v201_v30 }
  0x45   :  { %v112_v38 = vsel %vm111_vm2, %v109_v24, %v106_v34 }
  0x46   :  { %v139_v39 = vadd.f32 %v138_v35, %v137_v32  ;;  %v146_v40 = vadd.f32 %v145_v36, %v144_v33  ;;  %v121_v41 = vsel %vm120_vm3, %v118_v29, %v115_v37  ;;  %v122_v42 = vadd.f32 %v112_v38, %v102_v23 }
  0x47   :  { %v123_v43 = vadd.f32 %v121_v41, %v103_v28 }
  0x48   :  { %160 = vst [vmem:[#allocation8] sm:$0xff] %v139_v39  ;;  %161 = vst [vmem:[#allocation8 + $0x8] sm:$0xff] %v146_v40  ;;  %v124_v44 = vsub.f32 %v122_v42, %v72_v0  ;;  %v128_v45 = vmin.f32 %v122_v42, 100.0 }
  0x49   :  { %v125_v46 = vsub.f32 %v123_v43, %v73_v1  ;;  %v129_v47 = vmin.f32 %v123_v43, 100.0 }
  0x4a   :  { %v126_v48 = vmin.f32 %v124_v44, 100.0 }
  0x4b   :  { %v127_v49 = vmin.f32 %v125_v46, 100.0 }
  0x4c   :  { %v130_v50 = vsub.f32 %v126_v48, %v128_v45 }
  0x4d   :  { %v131_v51 = vsub.f32 %v127_v49, %v129_v47 }
  0x4e   :  { %v132_v52 = vmul.f32 %v130_v50, %v74_v26 }
  0x4f   :  { %v133_v53 = vmul.f32 %v131_v51, %v75_v31 }
  0x50   :  { %v134_v54 = vadd.f32 %v132_v52, %v128_v45 }
  0x51   :  { %v135_v55 = vadd.f32 %v133_v53, %v129_v47 }
  0x53   :  { %v151_v56 = vadd.f32 %v135_v55, %v134_v54 }
  0x55   :  { %162 = vst [vmem:[#allocation8 + $0x10] sm:$0xff] %v151_v56 }
  0x56   :  { %253 = shalt.err (!%p250_p0)
}
  0x57   :  { %174 = dma.vmem_to_hbm [thread:$0]  %s169_s1, 384, %s308_s2, [#allocation5], %s269_s12, %s269_s12, %s270_s13  }
  0x58   :  { %266 = dma.done.wait [#allocation5], 384  }
  0x59   :  { %267 = vsyncadd [#allocation5], 4294966912 }
  0x5a   :  { %178 = vsyncpa [#allocation4], 1 }
  0x5b   :  { %179 = vsyncpa [#allocation7], 1 }
  0x5c   :  { %180 = vsyncpa [#allocation5], 1 }

</bundles_post_ra>
